<compile_context>
chip_gen: v7x
topology: tpu7x:2x2x1
jax: 0.10.0
libtpu: 0.0.40
codegen_flags: <defaults>
</compile_context>

<pallas_src>
import functools

import jax
import jax.numpy as jnp
from jax.experimental import pallas as pl
from jax.experimental.pallas import tpu as pltpu


_LANE = 128
_SUBLANE_QUANTUM = {4: 8, 2: 16, 1: 32}        # itemsize -> sublane packing quantum
_TARGET_BLOCK_BYTES = 2 * 1024 * 1024          # ~2 MiB per block (per review)


def _round_up(a, b):
    return ((a + b - 1) // b) * b


def _compute_dtype_for(dtype):
    """f32 math on chips without low-precision VPU/EUP; native dtype on v6e/v7x."""
    if dtype == jnp.float32:
        return jnp.float32
    try:
        kind = jax.devices()[0].device_kind.lower()
        old_chip = any(tag in kind for tag in ("v2", "v3", "v4", "v5"))
    except Exception:
        old_chip = True
    return jnp.float32 if old_chip else dtype


def _silu_kernel(x_ref, o_ref, *, compute_dtype):
    x = x_ref[...].astype(compute_dtype)
    one = jnp.asarray(1.0, dtype=compute_dtype)
    # exp goes to the EUP; approx=False keeps the divide exact (f32 tolerance).
    sig = pl.reciprocal(jnp.exp(-x) + one, approx=False)
    o_ref[...] = (x * sig).astype(o_ref.dtype)


def _silu_2d(x2, *, target_block_bytes=_TARGET_BLOCK_BYTES):
    """SiLU over a 2-D (rows, cols) slab; cols is lane-dense by construction."""
    rows, cols = x2.shape
    dtype = x2.dtype
    itemsize = jnp.dtype(dtype).itemsize
    quantum = _SUBLANE_QUANTUM.get(itemsize, 8)

    if rows <= 2 * quantum:
        # Tiny slab: a single full-extent block (always a legal block shape).
        block_rows = rows
    else:
        target = max(quantum, target_block_bytes // (cols * itemsize))
        block_rows = _round_up(min(target, rows), quantum)
        # Keep grid extent >= 2 so ("parallel",) can shard across v7x's 2 TCs.
        half = _round_up(pl.cdiv(rows, 2), quantum)
        block_rows = max(quantum, min(block_rows, half))
        if block_rows >= rows:
            block_rows = rows

    grid = (pl.cdiv(rows, block_rows),)
    kernel = functools.partial(
        _silu_kernel, compute_dtype=_compute_dtype_for(dtype))

    n = rows * cols
    cost = pl.CostEstimate(flops=4 * n, transcendentals=n,
                           bytes_accessed=2 * n * itemsize)

    return pl.pallas_call(
        kernel,
        out_shape=jax.ShapeDtypeStruct((rows, cols), dtype),
        grid=grid,
        in_specs=[pl.BlockSpec((block_rows, cols), lambda i: (i, 0))],
        out_specs=pl.BlockSpec((block_rows, cols), lambda i: (i, 0)),
        compiler_params=pltpu.CompilerParams(
            dimension_semantics=("parallel",),
            vmem_limit_bytes=32 * 1024 * 1024),
        cost_estimate=cost,
    )(x2)


def silu(x):
    """Elementwise SiLU matching the PyTorch module's forward: x * sigmoid(x)."""
    orig_shape = x.shape
    n = x.size
    if n == 0:
        return x

    # Fast path: no pad / slice -- pure reshape to a lane-dense slab.
    if n % _LANE == 0:
        cols = _LANE
        for cand in (4096, 2048, 1024, 512, 256):
            if n % cand == 0:
                cols = cand
                break
        out2 = _silu_2d(x.reshape(n // cols, cols))
        return out2.reshape(orig_shape)

    # Ragged sizes: flatten + zero-pad (silu(0) == 0, so padding is safe),
    # then strip the padding afterwards.
    cols = 512 if n >= 4096 else _LANE
    rows = pl.cdiv(n, cols)
    n_padded = rows * cols
    x_flat = jnp.pad(jnp.ravel(x), (0, n_padded - n))
    out2 = _silu_2d(x_flat.reshape(rows, cols))
    return out2.reshape(-1)[:n].reshape(orig_shape)


def ref_silu(x):
    """Pure-JAX reference mirroring the PyTorch forward: x * sigmoid(x)."""
    return x * jax.nn.sigmoid(x)


if __name__ == "__main__":
    key = jax.random.PRNGKey(0)
    k1, k2, k3, k4 = jax.random.split(key, 4)

    # Small shape consistent with the transformer module (batch, seq, hidden).
    # Element count is a multiple of 128 -> fast (no-pad) path.
    x_small = jax.random.normal(k1, (2, 8, 32), jnp.float32)
    out_small = jax.block_until_ready(silu(x_small))
    assert out_small.shape == x_small.shape
    assert jnp.allclose(out_small, ref_silu(x_small), atol=1e-6, rtol=1e-5), \
        "small-shape mismatch vs reference"

    # Ragged shape -> padding fallback path, multi-step grid.
    x_ragged = jax.random.normal(k2, (4, 100, 300), jnp.float32)
    out_ragged = jax.block_until_ready(silu(x_ragged))
    assert out_ragged.shape == x_ragged.shape
    assert jnp.allclose(out_ragged, ref_silu(x_ragged), atol=1e-6, rtol=1e-5), \
        "ragged-shape mismatch vs reference"

    # Medium shape -> fast path with grid extent >= 2 (megacore-friendly).
    x_med = jax.random.normal(k3, (512, 2048), jnp.float32)
    out_med = jax.block_until_ready(silu(x_med))
    assert out_med.shape == x_med.shape
    assert jnp.allclose(out_med, ref_silu(x_med), atol=1e-6, rtol=1e-5), \
        "medium-shape mismatch vs reference"

    # bf16 activations -> dtype-aware sublane quantum; loose tolerance.
    x_bf16 = jax.random.normal(k4, (2, 16, 128), jnp.bfloat16)
    out_bf16 = jax.block_until_ready(silu(x_bf16))
    assert out_bf16.shape == x_bf16.shape and out_bf16.dtype == jnp.bfloat16
    ref_bf16 = ref_silu(x_bf16.astype(jnp.float32))
    assert jnp.allclose(out_bf16.astype(jnp.float32), ref_bf16,
                        atol=0.1, rtol=0.1), "bf16 mismatch vs reference"

    print("KERNEL_OK")
</pallas_src>

<mosaic_0001>
module attributes {stable_mosaic.version = 11 : i64} {
  func.func @_silu_kernel(%arg0: i32, %arg1: memref<1x512xf32, #tpu.memory_space<vmem>>, %arg2: memref<1x512xf32, #tpu.memory_space<vmem>>) attributes {dimension_semantics = [#tpu.dimension_semantics<parallel>], iteration_bounds = array<i64: 1>, scalar_prefetch = 0 : i64, scratch_operands = 0 : i64, tpu.core_type = #tpu.core_type<tc>, window_params = [{transform_indices = @transform_0, window_bounds = array<i64: 1, 512>}, {transform_indices = @transform_1, window_bounds = array<i64: 1, 512>}]} {
    %c0 = arith.constant 0 : index
    %c0_0 = arith.constant 0 : index
    %0 = vector.load %arg1[%c0, %c0_0] : memref<1x512xf32, #tpu.memory_space<vmem>>, vector<1x512xf32>
    %cst = arith.constant 0.000000e+00 : f32
    %1 = vector.broadcast %cst : f32 to vector<1x512xf32>
    %2 = arith.subf %1, %0 : vector<1x512xf32>
    %3 = math.exp %2 : vector<1x512xf32>
    %cst_1 = arith.constant 1.000000e+00 : f32
    %4 = vector.broadcast %cst_1 : f32 to vector<1x512xf32>
    %5 = arith.addf %3, %4 : vector<1x512xf32>
    %6 = tpu.reciprocal %5 : vector<1x512xf32> -> vector<1x512xf32>
    %7 = arith.mulf %0, %6 : vector<1x512xf32>
    %c0_2 = arith.constant 0 : index
    %c0_3 = arith.constant 0 : index
    %8 = vector.load %arg2[%c0_2, %c0_3] : memref<1x512xf32, #tpu.memory_space<vmem>>, vector<1x512xf32>
    tpu.vector_store %arg2[%c0_2, %c0_3], %7 {strides = array<i32>} : memref<1x512xf32, #tpu.memory_space<vmem>>, vector<1x512xf32>,
    return
  }
  func.func @transform_0(%arg0: i32) -> (i32, i32) {
    %c0_i32 = arith.constant 0 : i32
    %c0_i32_0 = arith.constant 0 : i32
    return %arg0, %c0_i32 : i32, i32
  }
  func.func @transform_1(%arg0: i32) -> (i32, i32) {
    %c0_i32 = arith.constant 0 : i32
    %c0_i32_0 = arith.constant 0 : i32
    return %arg0, %c0_i32 : i32, i32
  }
}

</mosaic_0001>

<bundles_post_ra>
// kernel: tpu_custom_call.1
= control target key start
LH: loop header
LB: loop body
LE: loop exit
PB: predicated region body
PF: predicated region fallthrough
CT: control target
= control target key end

     0   :  { %6 = vsyncpa [#allocation3], 0  ;;  %s138_s0 = inlined_call_operand.hbm [shape: f32[1,512], index: 0, kind: input, shape index: {}]   ;;  %s139_s1 = inlined_call_operand.hbm [shape: f32[1,512], index: 1, kind: output, shape index: {}]  }
   0x1   :  { %7 = vsyncpa [#allocation4], 0  ;;  %s102_s6 = smov [#allocation2]   ;;  %s54_s10 = scalar_lea.hbm %s138_s0, 64 }
   0x2   :  { %s14_s7 = sshll.u32 %s102_s6, 4  ;;  %p55_p0 = scmp.ne.s32.totalorder %s138_s0, %s54_s10  ;;  %s15_s7 = int_to_ptr.vmem [resolvable:$true] %s14_s7 }
   0x3   :  { %p58_p1 = scmp.lt.u32.totalorder %s54_s10, %s138_s0 }
   0x5   :  { %p60_p2 = pnand %p58_p1, %p55_p0 }
   0x7   :  { %63 = shalt.err (!%p60_p2)
}
   0x8   :  { %s64_s15 = scalar_lea.vmem %s15_s7, 64  ;;  %p69_p4 = scmp.lt.s32.totalorder %s15_s7, %s15_s7 }
   0x9   :  { %p65_p3 = scmp.ne.s32.totalorder %s15_s7, %s64_s15  ;;  %p70_p5 = scmp.lt.s32.totalorder %s64_s15, %s64_s15 }
   0xb   :  { %p71_p6 = por %p70_p5, %p69_p4 }
   0xd   :  { %p72_p7 = pnand %p71_p6, %p65_p3 }
   0xf   :  { %75 = shalt.err (!%p72_p7)
}
  0x10   :  { %17 = dma.hbm_to_vmem [thread:$0]  %s138_s0, 64, %s15_s7, [#allocation3]  }
  0x11   :  { %98 = dma.done.wait [#allocation3], 64  }
  0x12   :  { %99 = vsyncadd [#allocation3], 4294967232  ;;  %v21_v0 = vld [vmem:[#allocation2] sm:$0xf]  ;;  %v28_v5 = vlaneseq  ;;  %s103_s18 = smov [#allocation5]  }
  0x13   :  { %v22_v1 = vsub.f32 0.0, %v21_v0  ;;  %s39_s19 = sshll.u32 %s103_s18, 4  ;;  %s40_s19 = int_to_ptr.vmem [resolvable:$true] %s39_s19 }
  0x14   :  { %vm30_vm0 = vcmp.lt.s32.totalorder %v28_v5, 512  ;;  %s76_s20 = scalar_lea.vmem %s40_s19, 64  ;;  %p81_p9 = scmp.lt.s32.totalorder %s40_s19, %s40_s19 }
  0x15   :  { %v23_v2 = vmul.f32 1.442695, %v22_v1  ;;  %p77_p8 = scmp.ne.s32.totalorder %s40_s19, %s76_s20  ;;  %p82_p10 = scmp.lt.s32.totalorder %s76_s20, %s76_s20 }
  0x17   :  { %50 = vpow2.f32 %v23_v2  ;;  %p83_p11 = por %p82_p10, %p81_p9 }
  0x19   :  { %p84_p12 = pnand %p83_p11, %p77_p8 }
  0x21   :  { %v51_v3 = vpop.eup %50 }
  0x22   :  { %v25_v4 = vadd.f32 1.0, %v51_v3 }
  0x24   :  { %52 = vrcp.f32 %v25_v4 }
  0x2e   :  { %v53_v6 = vpop.eup %52 }
  0x2f   :  { %v27_v7 = vmul.f32 %v53_v6, %v21_v0 }
  0x31   :  { %32 = vst.msk [vmem:[#allocation5] sm:$0xf] %vm30_vm0, %v27_v7 }
  0x32   :  { %87 = shalt.err (!%p84_p12)
}
  0x33   :  { %s88_s22 = scalar_lea.hbm %s139_s1, 64 }
  0x34   :  { %p89_p13 = scmp.ne.s32.totalorder %s139_s1, %s88_s22  ;;  %p92_p0 = scmp.lt.u32.totalorder %s88_s22, %s139_s1 }
  0x36   :  { %p94_p1 = pnand %p92_p0, %p89_p13 }
  0x38   :  { %97 = shalt.err (!%p94_p1)
}
  0x39   :  { %42 = dma.vmem_to_hbm [thread:$0]  %s40_s19, 64, %s139_s1, [#allocation4]  }
  0x3a   :  { %100 = dma.done.wait [#allocation4], 64  }
  0x3b   :  { %101 = vsyncadd [#allocation4], 4294967232 }
  0x3c   :  { %46 = vsyncpa [#allocation3], 1 }
  0x3d   :  { %47 = vsyncpa [#allocation4], 1 }

</bundles_post_ra>
